<compile_context>
chip_gen: v6e
topology: v6e:2x2x1
jax: 0.10.0
libtpu: 0.0.40
codegen_flags: <defaults>
</compile_context>

<pallas_src>
import jax
import jax.numpy as jnp
from jax import lax
from jax.experimental import pallas as pl
from jax.experimental.pallas import tpu as pltpu

_LANE = 128
_SUBLANE = 8
_BLOCK_BYTES = 4 * 1024 * 1024       # per-input block budget (~16 MiB live, double-buffered)
_VMEM_LIMIT = 32 * 1024 * 1024       # explicit scoped-VMEM limit (safe on v5e/v6e/v7x)


def _round_up(x, m):
    return (x + m - 1) // m * m


def _make_dice_kernel(R, tile_r, C, P, need_mask, target_is_float):
    """Kernel over one (1, tile_r, C) block of pred/target -> (1,1,2P,C) partials."""

    def kernel(pred_ref, target_ref, out_ref):
        # sigmoid(x) > 0.5  <=>  x > 0  (sigmoid strictly monotone, sigmoid(0)=0.5)
        # -> pure VPU compare, no EUP transcendental.
        p = pred_ref[0] > 0
        if target_is_float:
            t = target_ref[0] > 0.5
        else:
            t = target_ref[0] > 0          # integer/bool targets: >0.5 after float() == >0

        if need_mask:
            # The last spatial tile over-reads past R rows; out-of-bounds data is
            # unspecified, so mask the boolean predicates (masked elems contribute 0).
            j = pl.program_id(1)
            row = lax.broadcasted_iota(jnp.int32, (tile_r, C), 0)
            valid = row < (R - j * tile_r)
            p = jnp.logical_and(p, valid)
            t = jnp.logical_and(t, valid)

        inter = jnp.logical_and(p, t).astype(jnp.float32)
        denom = p.astype(jnp.float32) + t.astype(jnp.float32)

        if P == _SUBLANE:
            # Sublane/lane-aligned VPU fold: (tile_r, C) -> (8, C), ~1 vreg add per
            # loaded vreg, no cross-lane XLU reduce in the steady state.
            inter = inter.reshape(tile_r // _SUBLANE, _SUBLANE, C).sum(axis=0)
            denom = denom.reshape(tile_r // _SUBLANE, _SUBLANE, C).sum(axis=0)
        else:
            # Small / ragged-row fallback (tile_r not a multiple of 8).
            inter = inter.sum(axis=0, keepdims=True)
            denom = denom.sum(axis=0, keepdims=True)

        out_ref[0, 0, :P, :] = inter
        out_ref[0, 0, P:, :] = denom

    return kernel


@jax.jit
def dice_metric_pallas(pred, target):
    """Pallas implementation of DiceMetric.forward.

    Args:
      pred:   (N, H, W) logits (any float/int dtype).
      target: (N, H, W) targets (float 0/1, bool, or int).

    Returns:
      scalar float32: 1 - mean_n( (2*inter_n + eps) / (|p_n| + |t_n| + eps) )
    """
    N, H, W = pred.shape
    S = H * W

    # ---- choose a (N, R, C) view without any padding / HBM copy -------------
    if S % _LANE == 0:
        R, C = S // _LANE, _LANE            # lane-dense; reshape is a free bitcast
        pred3 = pred.reshape(N, R, C)
        target3 = target.reshape(N, R, C)
    else:
        R, C = H, W                         # keep (N, H, W); W is the (full-dim) lane axis
        pred3, target3 = pred, target

    # ---- balanced row tiling (biggest block that fits the VMEM budget) ------
    itemsize = max(pred.dtype.itemsize, target.dtype.itemsize)
    row_bytes = _round_up(C, _LANE) * itemsize
    max_tile_r = max(_SUBLANE, (_BLOCK_BYTES // row_bytes) // _SUBLANE * _SUBLANE)

    if R <= max_tile_r:
        n_tiles, tile_r = 1, R
    else:
        n_tiles = pl.cdiv(R, max_tile_r)
        tile_r = _round_up(pl.cdiv(R, n_tiles), 32)   # 32: safe for f32/bf16/int8 packing
        if tile_r >= R:
            n_tiles, tile_r = 1, R
        else:
            n_tiles = pl.cdiv(R, tile_r)

    need_mask = (n_tiles * tile_r != R)
    P = _SUBLANE if (tile_r % _SUBLANE == 0) else 1
    target_is_float = jnp.issubdtype(target.dtype, jnp.floating)

    kernel = _make_dice_kernel(R, tile_r, C, P, need_mask, target_is_float)

    out_shape = jax.ShapeDtypeStruct((N, n_tiles, 2 * P, C), jnp.float32)
    out_bytes = N * n_tiles * 2 * P * C * 4
    cost = pl.CostEstimate(
        flops=8 * N * R * C,
        transcendentals=0,
        bytes_accessed=(pred3.size * pred.dtype.itemsize
                        + target3.size * target.dtype.itemsize
                        + out_bytes),
    )

    partials = pl.pallas_call(
        kernel,
        out_shape=out_shape,
        grid_spec=pltpu.PrefetchScalarGridSpec(
            num_scalar_prefetch=0,
            grid=(N, n_tiles),
            in_specs=[
                pl.BlockSpec((1, tile_r, C), lambda i, j: (i, j, 0)),
                pl.BlockSpec((1, tile_r, C), lambda i, j: (i, j, 0)),
            ],
            out_specs=pl.BlockSpec((1, 1, 2 * P, C), lambda i, j: (i, j, 0, 0)),
        ),
        compiler_params=pltpu.CompilerParams(
            dimension_semantics=("parallel", "parallel"),
            vmem_limit_bytes=_VMEM_LIMIT,
        ),
        cost_estimate=cost,
    )(pred3, target3)

    # ---- tiny final reduction + coefficient in the wrapper -------------------
    partials = partials.reshape(N, n_tiles, 2, P, C)
    sums = jnp.sum(partials, axis=(1, 3, 4))          # (N, 2): [inter, |p|+|t|]
    inter = sums[:, 0]
    denom = sums[:, 1]
    smooth = 0.0001
    coeff = (2.0 * inter + smooth) / (denom + smooth)
    return (1.0 - jnp.sum(coeff) / N).astype(jnp.float32)


def dice_metric_ref(pred, target):
    """Pure-JAX reference matching the PyTorch module."""
    pred = pred.astype(jnp.float32)
    target = target.astype(jnp.float32)
    smooth = 0.0001
    p = (jax.nn.sigmoid(pred) > 0.5).astype(jnp.float32)
    t = (target > 0.5).astype(jnp.float32)
    inter = jnp.sum(t * p, axis=(1, 2))
    dim1 = jnp.sum(p, axis=(1, 2))
    dim2 = jnp.sum(t, axis=(1, 2))
    coeff = (2.0 * inter + smooth) / (dim1 + dim2 + smooth)
    return 1.0 - jnp.sum(coeff) / coeff.shape[0]


if __name__ == "__main__":
    key = jax.random.PRNGKey(0)
    k1, k2 = jax.random.split(key)
    N, H, W = 2, 16, 16
    pred = jax.random.normal(k1, (N, H, W), dtype=jnp.float32)
    target = (jax.random.uniform(k2, (N, H, W)) > 0.5).astype(jnp.float32)

    out = dice_metric_pallas(pred, target)
    jax.block_until_ready(out)

    ref = dice_metric_ref(pred, target)
    assert jnp.allclose(out, ref, atol=1e-5), (out, ref)
    print("KERNEL_OK")
</pallas_src>

<mosaic_0001>
module attributes {stable_mosaic.version = 11 : i64} {
  func.func @kernel(%arg0: i32, %arg1: i32, %arg2: memref<1x2x128xf32, #tpu.memory_space<vmem>>, %arg3: memref<1x2x128xf32, #tpu.memory_space<vmem>>, %arg4: memref<1x1x2x128xf32, #tpu.memory_space<vmem>>) attributes {dimension_semantics = [#tpu.dimension_semantics<parallel>, #tpu.dimension_semantics<parallel>], iteration_bounds = array<i64: 2, 1>, scalar_prefetch = 0 : i64, scratch_operands = 0 : i64, tpu.core_type = #tpu.core_type<tc>, window_params = [{transform_indices = @transform_0, window_bounds = array<i64: 1, 2, 128>}, {transform_indices = @transform_1, window_bounds = array<i64: 1, 2, 128>}, {transform_indices = @transform_2, window_bounds = array<i64: 1, 1, 2, 128>}]} {
    %c0 = arith.constant 0 : index
    %c0_0 = arith.constant 0 : index
    %c0_1 = arith.constant 0 : index
    %0 = vector.load %arg2[%c0, %c0_0, %c0_1] : memref<1x2x128xf32, #tpu.memory_space<vmem>>, vector<1x2x128xf32>
    %1 = vector.shape_cast %0 : vector<1x2x128xf32> to vector<2x128xf32>
    %cst = arith.constant 0.000000e+00 : f32
    %2 = vector.broadcast %cst : f32 to vector<2x128xf32>
    %3 = arith.cmpf ogt, %1, %2 : vector<2x128xf32>
    %c0_2 = arith.constant 0 : index
    %c0_3 = arith.constant 0 : index
    %c0_4 = arith.constant 0 : index
    %4 = vector.load %arg3[%c0_2, %c0_3, %c0_4] : memref<1x2x128xf32, #tpu.memory_space<vmem>>, vector<1x2x128xf32>
    %5 = vector.shape_cast %4 : vector<1x2x128xf32> to vector<2x128xf32>
    %cst_5 = arith.constant 5.000000e-01 : f32
    %6 = vector.broadcast %cst_5 : f32 to vector<2x128xf32>
    %7 = arith.cmpf ogt, %5, %6 : vector<2x128xf32>
    %8 = arith.andi %3, %7 : vector<2x128xi1>
    %9 = arith.extui %8 : vector<2x128xi1> to vector<2x128xi32>
    %10 = arith.sitofp %9 : vector<2x128xi32> to vector<2x128xf32>
    %11 = arith.extui %3 : vector<2x128xi1> to vector<2x128xi32>
    %12 = arith.sitofp %11 : vector<2x128xi32> to vector<2x128xf32>
    %13 = arith.extui %7 : vector<2x128xi1> to vector<2x128xi32>
    %14 = arith.sitofp %13 : vector<2x128xi32> to vector<2x128xf32>
    %15 = arith.addf %12, %14 : vector<2x128xf32>
    %cst_6 = arith.constant dense<0.000000e+00> : vector<128xf32>
    %16 = vector.multi_reduction <add>, %10, %cst_6 [0] : vector<2x128xf32> to vector<128xf32>
    %17 = vector.shape_cast %16 : vector<128xf32> to vector<1x128xf32>
    %cst_7 = arith.constant dense<0.000000e+00> : vector<128xf32>
    %18 = vector.multi_reduction <add>, %15, %cst_7 [0] : vector<2x128xf32> to vector<128xf32>
    %19 = vector.shape_cast %18 : vector<128xf32> to vector<1x128xf32>
    %c0_8 = arith.constant 0 : index
    %c0_9 = arith.constant 0 : index
    %c0_10 = arith.constant 0 : index
    %c0_11 = arith.constant 0 : index
    %20 = vector.load %arg4[%c0_8, %c0_9, %c0_10, %c0_11] : memref<1x1x2x128xf32, #tpu.memory_space<vmem>>, vector<1x1x1x128xf32>
    %21 = vector.shape_cast %20 : vector<1x1x1x128xf32> to vector<1x128xf32>
    %22 = vector.shape_cast %17 : vector<1x128xf32> to vector<1x1x1x128xf32>
    tpu.vector_store %arg4[%c0_8, %c0_9, %c0_10, %c0_11], %22 {strides = array<i32>} : memref<1x1x2x128xf32, #tpu.memory_space<vmem>>, vector<1x1x1x128xf32>,
    %c0_12 = arith.constant 0 : index
    %c0_13 = arith.constant 0 : index
    %c1 = arith.constant 1 : index
    %c0_14 = arith.constant 0 : index
    %23 = vector.load %arg4[%c0_12, %c0_13, %c1, %c0_14] : memref<1x1x2x128xf32, #tpu.memory_space<vmem>>, vector<1x1x1x128xf32>
    %24 = vector.shape_cast %23 : vector<1x1x1x128xf32> to vector<1x128xf32>
    %25 = vector.shape_cast %19 : vector<1x128xf32> to vector<1x1x1x128xf32>
    tpu.vector_store %arg4[%c0_12, %c0_13, %c1, %c0_14], %25 {strides = array<i32>} : memref<1x1x2x128xf32, #tpu.memory_space<vmem>>, vector<1x1x1x128xf32>,
    return
  }
  func.func @transform_0(%arg0: i32, %arg1: i32) -> (i32, i32, i32) {
    %c0_i32 = arith.constant 0 : i32
    %c0_i32_0 = arith.constant 0 : i32
    return %arg0, %arg1, %c0_i32 : i32, i32, i32
  }
  func.func @transform_1(%arg0: i32, %arg1: i32) -> (i32, i32, i32) {
    %c0_i32 = arith.constant 0 : i32
    %c0_i32_0 = arith.constant 0 : i32
    return %arg0, %arg1, %c0_i32 : i32, i32, i32
  }
  func.func @transform_2(%arg0: i32, %arg1: i32) -> (i32, i32, i32, i32) {
    %c0_i32 = arith.constant 0 : i32
    %c0_i32_0 = arith.constant 0 : i32
    %c0_i32_1 = arith.constant 0 : i32
    return %arg0, %arg1, %c0_i32, %c0_i32_0 : i32, i32, i32, i32
  }
}

</mosaic_0001>

<bundles_post_ra>
// kernel: dice_metric_pallas.1
= control target key start
LH: loop header
LB: loop body
LE: loop exit
PB: predicated region body
PF: predicated region fallthrough
CT: control target
= control target key end

     0   :  { %s394_s9 = smov 0   ;;  %s396_s10 = smov 0   ;;  %s430_s0 = inlined_call_operand.vmem [shape: f32[2,2,128], index: 0, kind: input, shape index: {}]   ;;  %s431_s1 = inlined_call_operand.vmem [shape: f32[2,2,128], index: 1, kind: input, shape index: {}]   ;;  %s432_s2 = inlined_call_operand.vmem [shape: f32[2,1,2,128], index: 2, kind: output, shape index: {}]  }
   0x1   :  { %s398_s11 = smov 0  }
   0x2 LB: > { %s24_s12 = sadd.s32 1, %s372_s10  ;;  %p320_p0 = scmp.ge.s32.totalorder %s376_s11, 1  ;;  %s376_s11 = sphi %s398_s11, %s12_s11   ;;  %s372_s10 = sphi %s396_s10, %s434_s10   ;;  %s368_s9 = sphi %s394_s9, %s433_s9  }
   0x3   : > { %p26_p1 = scmp.ge.s32.totalorder %s24_s12, 2  ;;  %p144_p2 = scmp.lt.s32.totalorder %s376_s11, 3 }
   0x5   : > { %s436_s12 = smov (%p26_p1, %s24_s12), 0  ;;  %p145_p3 = pnand %p320_p0, %p144_p2 }
   0x6   : > { %p177_p4 = scmp.lt.s32.totalorder (!%p145_p3), %s368_s9, 1 }
   0x7   : > { %148 = sbr.rel (%p145_p3) target bundleno = 35 (0x23), region = 28 }
   0xc   : > { %s438_s9 = smov (!%p177_p4, %s368_s9), 1  ;;  %vm210_vm2 = vcmask 1041408   ;;  %v378_v2 = vmov 0.0  }
   0xd   : > { %s321_s13 = sshll.u32 %s438_s9, 1 }
   0xe   : > { %s183_s16 = scalar_lea.vmem %s430_s0, %s321_s13  ;;  %s190_s19 = scalar_lea.vmem %s431_s1, %s321_s13 }
   0xf   : > { %v198_v0 = vld [vmem:[%s183_s16] sm:$0x3]  ;;  %s197_s22 = scalar_lea.vmem %s432_s2, %s321_s13 }
  0x10   : > { %v200_v1 = vld [vmem:[%s190_s19] sm:$0x3]  ;;  %vm199_vm0 = vcmp.gt.f32.partialorder %v198_v0, 0.0 }
  0x11   : > { %vm201_vm1 = vcmp.gt.f32.partialorder %v200_v1, 0.5  ;;  %v325_v3 = vsel %vm199_vm0, 1.0, %v378_v2 }
  0x12   : > { %vm202_vm3 = vmand %vm199_vm0, %vm201_vm1  ;;  %v326_v4 = vsel %vm201_vm1, 1.0, %v378_v2 }
  0x13   : > { %v324_v5 = vsel %vm202_vm3, 1.0, %v378_v2  ;;  %v209_v6 = vadd.f32 %v326_v4, %v325_v3 }
  0x14   : > { %v211_v7 = vsel %vm210_vm2, %v324_v5, 0.0 }
  0x15   : > { %v212_v8 = vrot.slane %v211_v7, 4  ;;  %v218_v9 = vsel %vm210_vm2, %v209_v6, 0.0 }
  0x16   : > { %v219_v10 = vrot.slane %v218_v9, 4 }
  0x17   : > { %v213_v11 = vadd.f32 %v212_v8, %v211_v7 }
  0x18   : > { %v220_v12 = vadd.f32 %v219_v10, %v218_v9 }
  0x19   : > { %v214_v13 = vrot.slane %v213_v11, 2 }
  0x1a   : > { %v221_v14 = vrot.slane %v220_v12, 2 }
  0x1b   : > { %v215_v15 = vadd.f32 %v214_v13, %v213_v11 }
  0x1c   : > { %v222_v16 = vadd.f32 %v221_v14, %v220_v12 }
  0x1d   : > { %v216_v17 = vrot.slane %v215_v15, 1 }
  0x1e   : > { %v223_v18 = vrot.slane %v222_v16, 1 }
  0x1f   : > { %v217_v19 = vadd.f32 %v216_v17, %v215_v15 }
  0x20   : > { %v224_v20 = vadd.f32 %v223_v18, %v222_v16 }
  0x21   : > { %225 = vst [vmem:[%s197_s22] sm:$0x1] %v217_v19 }
  0x22   : > { %226 = vst [vmem:[%s197_s22 + $0x1] sm:$0x1] %v224_v20 }
  0x23 PF: > { %s12_s11 = sadd.s32 1, %s376_s11   ;;  %s433_s9 = smov %s372_s10 }
  0x24   : > { %p9_p5 = scmp.ge.s32.totalorder %s12_s11, 4   ;;  %s434_s10 = smov %s436_s12 }
  0x26   :  { %11 = sbr.rel (!%p9_p5) target bundleno = 2 (0x2), region = 61 }

</bundles_post_ra>
